<compile_context>
chip_gen: v5e
topology: v5e:2x2
jax: 0.10.0
libtpu: 0.0.40
codegen_flags: <defaults>
</compile_context>

<pallas_src>
import jax
import jax.numpy as jnp
from jax.experimental import pallas as pl
from jax.experimental.pallas import tpu as pltpu


def _round_up(x, m):
    return (x + m - 1) // m * m


# --------------------------------------------------------------------------
# Parameter packing (done once, outside the kernel).
#   w1t  : (L, S_pad)  = W1^T, zero padded            (separate small array)
#   slab : (2L + A_pad, L) packed, zero padded:
#     rows [0, L)            : W2^T            (out-features x in-features)
#     rows [L, L + A_pad)    : W3^T
#     rows [L + A_pad, ...)  : bias columns -- lane 0 = b1, lane 1 = b2, lane 2 = b3
# --------------------------------------------------------------------------
def pack_actor_params(params):
    w1, b1 = params["w1"], params["b1"]   # (S, H), (1, H)
    w2, b2 = params["w2"], params["b2"]   # (H, H), (1, H)
    w3, b3 = params["w3"], params["b3"]   # (H, A), (1, A)

    S, H = w1.shape
    A = w3.shape[1]
    L = _round_up(H, 128)                 # lane width of the slab / hidden pad
    S_pad = _round_up(max(S, 1), 8)
    A_pad = _round_up(max(A, 1), 8)
    assert H <= L and A_pad <= L and S_pad <= 128

    off_w2 = 0
    off_w3 = off_w2 + L
    off_b = off_w3 + A_pad
    rows = off_b + L

    f32 = jnp.float32
    slab = jnp.zeros((rows, L), f32)
    slab = slab.at[off_w2:off_w2 + H, :H].set(w2.T.astype(f32))
    slab = slab.at[off_w3:off_w3 + A, :H].set(w3.T.astype(f32))
    slab = slab.at[off_b:off_b + H, 0].set(b1.reshape(-1).astype(f32))
    slab = slab.at[off_b:off_b + H, 1].set(b2.reshape(-1).astype(f32))
    slab = slab.at[off_b:off_b + A, 2].set(b3.reshape(-1).astype(f32))

    w1t = jnp.zeros((L, S_pad), f32).at[:H, :S].set(w1.T.astype(f32))

    meta = dict(S=S, H=H, A=A, L=L, S_pad=S_pad, A_pad=A_pad,
                off_w2=off_w2, off_w3=off_w3, off_b=off_b)
    return w1t, slab, meta


# --------------------------------------------------------------------------
# Kernel: one batch tile (lanes) per grid step; weights VMEM-resident.
# --------------------------------------------------------------------------
def _make_kernel(meta, action_bound):
    L, A_pad = meta["L"], meta["A_pad"]
    off_w2, off_w3, off_b = meta["off_w2"], meta["off_w3"], meta["off_b"]
    bound = float(action_bound)            # baked-in constant, no SMEM fetch

    def kernel(x_ref, w1t_ref, slab_ref, o_ref):
        x = x_ref[...]                                   # (S_pad, tb), batch on lanes
        w1t = w1t_ref[...]                               # (L, S_pad)
        w2t = slab_ref[off_w2:off_w2 + L, :]             # (L, L)
        w3t = slab_ref[off_w3:off_w3 + A_pad, :]         # (A_pad, L)
        b1 = slab_ref[off_b:off_b + L, 0:1]              # (L, 1)
        b2 = slab_ref[off_b:off_b + L, 1:2]              # (L, 1)
        b3 = slab_ref[off_b:off_b + A_pad, 2:3]          # (A_pad, 1)

        # fc1 + ReLU: MXU dot with K = S_pad (zero-padded), exact f32 bias add.
        h1 = jnp.maximum(
            jnp.dot(w1t, x, preferred_element_type=jnp.float32) + b1, 0.0)   # (L, tb)

        # fc2 + ReLU: MXU dot, K = L.
        h2 = jnp.maximum(
            jnp.dot(w2t, h1, preferred_element_type=jnp.float32) + b2, 0.0)  # (L, tb)

        # fc3 (MXU, M = A_pad) + tanh * action_bound.
        a = jnp.tanh(
            jnp.dot(w3t, h2, preferred_element_type=jnp.float32) + b3) * bound  # (A_pad, tb)

        o_ref[...] = a.astype(o_ref.dtype)               # full (8,128)-vreg stores

    return kernel


# --------------------------------------------------------------------------
# Wrapper (caller-side transpose / pad only).
# --------------------------------------------------------------------------
def actor_forward(x, w1t, slab, meta, action_bound, *, block_b=2048):
    """x: (B, n_states) f32.  w1t/slab/meta: from pack_actor_params.
    Returns (B, n_actions) f32."""
    B, S = x.shape
    assert S == meta["S"], (S, meta["S"])
    L, S_pad, A, A_pad = meta["L"], meta["S_pad"], meta["A"], meta["A_pad"]
    block_b = _round_up(block_b, 128)

    if B <= 256:
        # Latency path: single grid step, block == full (padded) array.
        # TODO(synk): for B~1-2 RL action selection, fuse exploration-noise add
        # and clipping into this same pallas_call / batch across envs to
        # amortize launch overhead (kernel body is <<1 us of work).
        tb, b_pad = B, B
    else:
        # Training path: >= 2 grid steps so v7x's two TensorCores both get work.
        tb = min(block_b, _round_up((B + 1) // 2, 128))
        b_pad = _round_up(B, tb)
    grid = (b_pad // tb,)

    # Feature-major (batch-on-lanes), zero-padded input: (S_pad, b_pad).
    x_fm = jnp.zeros((S_pad, b_pad), jnp.float32).at[:S, :B].set(
        x.T.astype(jnp.float32))

    kernel = _make_kernel(meta, action_bound)

    cost = pl.CostEstimate(
        flops=2 * b_pad * (S_pad * L + L * L + L * A_pad),
        transcendentals=b_pad * A_pad,
        bytes_accessed=int((x_fm.size + w1t.size + slab.size + A_pad * b_pad) * 4),
    )

    out_fm = pl.pallas_call(
        kernel,
        out_shape=jax.ShapeDtypeStruct((A_pad, b_pad), jnp.float32),
        grid=grid,
        in_specs=[
            pl.BlockSpec((S_pad, tb), lambda i: (0, i)),    # lane-dense x tiles
            pl.BlockSpec(w1t.shape, lambda i: (0, 0)),      # weights: fetched once,
            pl.BlockSpec(slab.shape, lambda i: (0, 0)),     # VMEM-resident across steps
        ],
        out_specs=pl.BlockSpec((A_pad, tb), lambda i: (0, i)),
        compiler_params=pltpu.CompilerParams(
            dimension_semantics=("parallel",)),             # batch tiles -> both v7x TCs
        cost_estimate=cost,
    )(x_fm, w1t, slab)

    return out_fm[:A, :B].T                                 # (B, A)


# --------------------------------------------------------------------------
# Init + pure-JAX reference
# --------------------------------------------------------------------------
def init_actor_params(key, n_states, hidden, n_actions):
    """Deterministic init mirroring nn.Linear's U(-1/sqrt(fan_in), 1/sqrt(fan_in))."""
    ks = jax.random.split(key, 6)

    def linear(kw, kb, fan_in, fan_out):
        lim = 1.0 / jnp.sqrt(jnp.asarray(fan_in, jnp.float32))
        w = jax.random.uniform(kw, (fan_in, fan_out), jnp.float32, -lim, lim)
        b = jax.random.uniform(kb, (1, fan_out), jnp.float32, -lim, lim)
        return w, b

    w1, b1 = linear(ks[0], ks[1], n_states, hidden)
    w2, b2 = linear(ks[2], ks[3], hidden, hidden)
    w3, b3 = linear(ks[4], ks[5], hidden, n_actions)
    return {"w1": w1, "b1": b1, "w2": w2, "b2": b2, "w3": w3, "b3": b3}


def actor_reference(x, params, action_bound):
    h1 = jnp.maximum(x @ params["w1"] + params["b1"], 0.0)
    h2 = jnp.maximum(h1 @ params["w2"] + params["b2"], 0.0)
    return jnp.tanh(h2 @ params["w3"] + params["b3"]) * action_bound


if __name__ == "__main__":
    # Pendulum-v1 config: n_states=3, n_actions=1, action_bound=2.0
    batch, n_states, hidden, n_actions = 2, 3, 32, 1
    action_bound = 2.0

    key = jax.random.PRNGKey(0)
    k_x, k_p, k_xb = jax.random.split(key, 3)
    params = init_actor_params(k_p, n_states, hidden, n_actions)
    w1t, slab, meta = pack_actor_params(params)          # pack once, reuse every call

    fwd = jax.jit(lambda xx: actor_forward(xx, w1t, slab, meta, action_bound))

    # Small (action-selection style) batch: single-step latency path.
    x = jax.random.normal(k_x, (batch, n_states), dtype=jnp.float32)
    out = jax.block_until_ready(fwd(x))
    ref = actor_reference(x, params, action_bound)
    assert out.shape == (batch, n_actions)
    assert jnp.allclose(out, ref, atol=1e-4, rtol=1e-4), (out, ref)

    # Larger (training style) batch: exercises padding + multi-step parallel grid.
    xb = jax.random.normal(k_xb, (1000, n_states), dtype=jnp.float32)
    outb = jax.block_until_ready(fwd(xb))
    refb = actor_reference(xb, params, action_bound)
    assert outb.shape == (1000, n_actions)
    assert jnp.allclose(outb, refb, atol=1e-4, rtol=1e-4)

    print("KERNEL_OK")
</pallas_src>

<mosaic_0001>
module attributes {stable_mosaic.version = 11 : i64} {
  func.func @kernel(%arg0: i32, %arg1: memref<8x2xf32, #tpu.memory_space<vmem>>, %arg2: memref<128x8xf32, #tpu.memory_space<vmem>>, %arg3: memref<264x128xf32, #tpu.memory_space<vmem>>, %arg4: memref<8x2xf32, #tpu.memory_space<vmem>>) attributes {dimension_semantics = [#tpu.dimension_semantics<parallel>], iteration_bounds = array<i64: 1>, scalar_prefetch = 0 : i64, scratch_operands = 0 : i64, tpu.core_type = #tpu.core_type<tc>, window_params = [{transform_indices = @transform_0, window_bounds = array<i64: 8, 2>}, {pipeline_mode = #tpu.pipeline_mode<synchronous>, transform_indices = @transform_1, window_bounds = array<i64: 128, 8>}, {pipeline_mode = #tpu.pipeline_mode<synchronous>, transform_indices = @transform_2, window_bounds = array<i64: 264, 128>}, {transform_indices = @transform_3, window_bounds = array<i64: 8, 2>}]} {
    %c0 = arith.constant 0 : index
    %c0_0 = arith.constant 0 : index
    %0 = vector.load %arg1[%c0, %c0_0] : memref<8x2xf32, #tpu.memory_space<vmem>>, vector<8x2xf32>
    %c0_1 = arith.constant 0 : index
    %c0_2 = arith.constant 0 : index
    %1 = vector.load %arg2[%c0_1, %c0_2] : memref<128x8xf32, #tpu.memory_space<vmem>>, vector<128x8xf32>
    %c0_3 = arith.constant 0 : index
    %c0_4 = arith.constant 0 : index
    %2 = vector.load %arg3[%c0_3, %c0_4] : memref<264x128xf32, #tpu.memory_space<vmem>>, vector<128x128xf32>
    %c128 = arith.constant 128 : index
    %c0_5 = arith.constant 0 : index
    %3 = vector.load %arg3[%c128, %c0_5] : memref<264x128xf32, #tpu.memory_space<vmem>>, vector<8x128xf32>
    %c136 = arith.constant 136 : index
    %c0_6 = arith.constant 0 : index
    %4 = vector.load %arg3[%c136, %c0_6] : memref<264x128xf32, #tpu.memory_space<vmem>>, vector<128x1xf32>
    %c136_7 = arith.constant 136 : index
    %c1 = arith.constant 1 : index
    %5 = vector.load %arg3[%c136_7, %c1] : memref<264x128xf32, #tpu.memory_space<vmem>>, vector<128x1xf32>
    %c136_8 = arith.constant 136 : index
    %c2 = arith.constant 2 : index
    %6 = vector.load %arg3[%c136_8, %c2] : memref<264x128xf32, #tpu.memory_space<vmem>>, vector<8x1xf32>
    %cst = arith.constant dense<0.000000e+00> : vector<128x2xf32>
    %7 = tpu.matmul %1, %0, %cst {dimension_numbers = #tpu.dot_dimension_numbers<[1], [0], [0], [1], [0, 0, 1, 1], [], []>} : vector<128x8xf32>, vector<8x2xf32>, vector<128x2xf32> -> vector<128x2xf32>
    %8 = vector.broadcast %4 : vector<128x1xf32> to vector<128x2xf32>
    %9 = arith.addf %7, %8 : vector<128x2xf32>
    %cst_9 = arith.constant 0.000000e+00 : f32
    %10 = vector.broadcast %cst_9 : f32 to vector<128x2xf32>
    %11 = arith.maximumf %9, %10 : vector<128x2xf32>
    %cst_10 = arith.constant dense<0.000000e+00> : vector<128x2xf32>
    %12 = tpu.matmul %2, %11, %cst_10 {dimension_numbers = #tpu.dot_dimension_numbers<[1], [0], [0], [1], [0, 0, 1, 1], [], []>} : vector<128x128xf32>, vector<128x2xf32>, vector<128x2xf32> -> vector<128x2xf32>
    %13 = vector.broadcast %5 : vector<128x1xf32> to vector<128x2xf32>
    %14 = arith.addf %12, %13 : vector<128x2xf32>
    %cst_11 = arith.constant 0.000000e+00 : f32
    %15 = vector.broadcast %cst_11 : f32 to vector<128x2xf32>
    %16 = arith.maximumf %14, %15 : vector<128x2xf32>
    %cst_12 = arith.constant dense<0.000000e+00> : vector<8x2xf32>
    %17 = tpu.matmul %3, %16, %cst_12 {dimension_numbers = #tpu.dot_dimension_numbers<[1], [0], [0], [1], [0, 0, 1, 1], [], []>} : vector<8x128xf32>, vector<128x2xf32>, vector<8x2xf32> -> vector<8x2xf32>
    %18 = vector.broadcast %6 : vector<8x1xf32> to vector<8x2xf32>
    %19 = arith.addf %17, %18 : vector<8x2xf32>
    %20 = math.tanh %19 : vector<8x2xf32>
    %cst_13 = arith.constant 2.000000e+00 : f32
    %21 = vector.broadcast %cst_13 : f32 to vector<8x2xf32>
    %22 = arith.mulf %20, %21 : vector<8x2xf32>
    %c0_14 = arith.constant 0 : index
    %c0_15 = arith.constant 0 : index
    %23 = vector.load %arg4[%c0_14, %c0_15] : memref<8x2xf32, #tpu.memory_space<vmem>>, vector<8x2xf32>
    tpu.vector_store %arg4[%c0_14, %c0_15], %22 {strides = array<i32>} : memref<8x2xf32, #tpu.memory_space<vmem>>, vector<8x2xf32>,
    return
  }
  func.func @transform_0(%arg0: i32) -> (i32, i32) {
    %c0_i32 = arith.constant 0 : i32
    %c0_i32_0 = arith.constant 0 : i32
    return %c0_i32, %arg0 : i32, i32
  }
  func.func @transform_1(%arg0: i32) -> (i32, i32) {
    %c0_i32 = arith.constant 0 : i32
    %c0_i32_0 = arith.constant 0 : i32
    %c0_i32_1 = arith.constant 0 : i32
    return %c0_i32, %c0_i32_0 : i32, i32
  }
  func.func @transform_2(%arg0: i32) -> (i32, i32) {
    %c0_i32 = arith.constant 0 : i32
    %c0_i32_0 = arith.constant 0 : i32
    %c0_i32_1 = arith.constant 0 : i32
    return %c0_i32, %c0_i32_0 : i32, i32
  }
  func.func @transform_3(%arg0: i32) -> (i32, i32) {
    %c0_i32 = arith.constant 0 : i32
    %c0_i32_0 = arith.constant 0 : i32
    return %c0_i32, %arg0 : i32, i32
  }
}

</mosaic_0001>

<bundles_post_ra>
// kernel: _lambda_.1
= control target key start
LH: loop header
LB: loop body
LE: loop exit
PB: predicated region body
PF: predicated region fallthrough
CT: control target
= control target key end

     0   :  { %8 = vsyncpa [#allocation3], 0  ;;  %s732_s0 = inlined_call_operand.vmem [shape: f32[8,2], index: 0, kind: input, shape index: {}]   ;;  %s733_s1 = inlined_call_operand.hbm [shape: f32[128,8], index: 1, kind: input, shape index: {}]   ;;  %s734_s2 = inlined_call_operand.hbm [shape: f32[264,128], index: 2, kind: input, shape index: {}]   ;;  %s735_s3 = inlined_call_operand.vmem [shape: f32[8,2], index: 3, kind: output, shape index: {}]  }
   0x1   :  { %s16_s14 = sshll.u32 %s733_s1, 4  ;;  %s17_s14 = int_to_ptr.hbm [resolvable:$true] %s16_s14 }
   0x2   :  { %9 = vsyncpa [#allocation5], 0  ;;  %s588_s15 = smov [#allocation2]   ;;  %s29_s19 = sshll.u32 %s734_s2, 4  ;;  %s30_s19 = int_to_ptr.hbm [resolvable:$true] %s29_s19 }
   0x3   :  { %s18_s16 = sshll.u32 %s588_s15, 4  ;;  %s589_s20 = smov 128   ;;  %s19_s16 = int_to_ptr.vmem [resolvable:$true] %s18_s16 }
   0x4   :  { %s590_s21 = smov 8   ;;  %s591_s22 = smov [#allocation4]  }
   0x5   :  { %24 = dma.hbm_to_vmem [thread:$0]  %s17_s14, 2048, %s19_s16, [#allocation3], %s589_s20, %s589_s20, %s590_s21  }
   0x6   :  { %s31_s23 = sshll.u32 %s591_s22, 4  ;;  %s32_s23 = int_to_ptr.vmem [resolvable:$true] %s31_s23 }
   0x7   :  { %37 = dma.hbm_to_vmem [thread:$0]  %s30_s19, 4224, %s32_s23, [#allocation5], %s589_s20, %s589_s20, %s590_s21  }
   0x8   :  { %584 = dma.done.wait [#allocation3], 2048  }
   0x9   :  { %585 = vsyncadd [#allocation3], 4294965248 }
   0xa   :  { %586 = dma.done.wait [#allocation5], 4224  }
   0xb   :  { %587 = vsyncadd [#allocation5], 4294963072  ;;  %v592_v0 = vmov 0   ;;  %v621_v1 = vld [vmem:[#allocation4 + $0x100] sm:$0xff]  ;;  %v623_v2 = vld [vmem:[#allocation4 + $0xf0] sm:$0xff]  ;;  %vm177_vm0 = vcmask 64512  }
   0xc   :  { %528 = vset.pattern.permute.xlu1 %v592_v0  ;;  %527 = vset.pattern.permute.xlu0 %v592_v0  ;;  %v46_v3 = vld [vmem:[%s732_s0] sm:$0xff]  ;;  %v58_v5 = vld [vmem:[#allocation2 + $0x58] sm:$0xff]  ;;  %v637_v8 = vld [vmem:[#allocation4 + $0xe8] sm:$0xff]  ;;  %vm479_vm1 = vcmask 15360  }
   0xd   :  { %529 = vset.pattern.permute.xlu2 %v592_v0  ;;  %174 = vperm.xlu0 %527, %v621_v1   ;;  %v47_v4 = vld [vmem:[#allocation2] sm:$0xff]  ;;  %v635_v7 = vld [vmem:[#allocation4 + $0xf8] sm:$0xff]  ;;  %v48_v9 = vld [vmem:[#allocation2 + $0x8] sm:$0xff] }
   0xe   :  { %164 = vperm.xlu1 %528, %v623_v2   ;;  %241 = vmatpush.msra.mxu0 %v46_v3  ;;  %v632_v6 = vld [vmem:[#allocation4 + $0xe0] sm:$0xff]  ;;  %v641_v11 = vld [vmem:[#allocation4 + $0xd8] sm:$0xff]  ;;  %v646_v12 = vld [vmem:[#allocation4 + $0xd0] sm:$0xff] }
   0xf   :  { %503 = vmatpush.msra.mxu2 %v46_v3  ;;  %487 = vmatmul.msk.f32.vlgmr.msra.gmra.mxu0 %vm177_vm0, %v47_v4  ;;  %v59_v10 = vld [vmem:[#allocation2 + $0x60] sm:$0xff]  ;;  %v648_v13 = vld [vmem:[#allocation4 + $0xc8] sm:$0xff]  ;;  %v49_v14 = vld [vmem:[#allocation2 + $0x10] sm:$0xff] }
  0x10   :  { %498 = vmatmul.msk.f32.vlgmr.msra.gmra.mxu2 %vm177_vm0, %v58_v5  ;;  %154 = vperm.xlu2 %529, %v632_v6   ;;  %v60_v15 = vld [vmem:[#allocation2 + $0x68] sm:$0xff]  ;;  %v652_v16 = vld [vmem:[#allocation4 + $0xc0] sm:$0xff]  ;;  %v657_v17 = vld [vmem:[#allocation4 + $0xb8] sm:$0xff] }
  0x11   :  { %v659_v18 = vld [vmem:[#allocation4 + $0xb0] sm:$0xff]  ;;  %v50_v19 = vld [vmem:[#allocation2 + $0x18] sm:$0xff]  ;;  %v663_v21 = vld [vmem:[#allocation4 + $0xa8] sm:$0xff] }
  0x12   :  { %v61_v20 = vld [vmem:[#allocation2 + $0x70] sm:$0xff]  ;;  %v668_v22 = vld [vmem:[#allocation4 + $0xa0] sm:$0xff]  ;;  %v670_v23 = vld [vmem:[#allocation4 + $0x98] sm:$0xff] }
  0x13   :  { %v51_v24 = vld [vmem:[#allocation2 + $0x20] sm:$0xff]  ;;  %v62_v25 = vld [vmem:[#allocation2 + $0x78] sm:$0xff]  ;;  %v674_v26 = vld [vmem:[#allocation4 + $0x90] sm:$0xff] }
  0x14   :  { %v679_v27 = vld [vmem:[#allocation4 + $0x88] sm:$0xff]  ;;  %v53_v29 = vld [vmem:[#allocation2 + $0x30] sm:$0xff]  ;;  %v54_v30 = vld [vmem:[#allocation2 + $0x38] sm:$0xff] }
  0x15   :  { %169 = vperm.xlu0 %527, %v635_v7   ;;  %v52_v28 = vld [vmem:[#allocation2 + $0x28] sm:$0xff]  ;;  %v55_v31 = vld [vmem:[#allocation2 + $0x40] sm:$0xff]  ;;  %v57_v33 = vld [vmem:[#allocation2 + $0x50] sm:$0xff] }
  0x16   :  { %159 = vperm.xlu1 %528, %v637_v8   ;;  %v56_v32 = vld [vmem:[#allocation2 + $0x48] sm:$0xff] }
  0x17   :  { %488 = vmatmul.msk.f32.gmra.mxu0 %vm177_vm0, %v48_v9  ;;  %v593_v9 = vmov 1  }
  0x18   :  { %499 = vmatmul.msk.f32.gmra.mxu2 %vm177_vm0, %v59_v10  ;;  %149 = vperm.xlu2 %529, %v641_v11  }
  0x1d   :  { %144 = vperm.xlu0 %527, %v646_v12  }
  0x1e   :  { %139 = vperm.xlu1 %528, %v648_v13  }
  0x1f   :  { %489 = vmatmul.msk.f32.gmra.mxu0 %vm177_vm0, %v49_v14 }
  0x20   :  { %500 = vmatmul.msk.f32.gmra.mxu2 %vm177_vm0, %v60_v15  ;;  %134 = vperm.xlu2 %529, %v652_v16  }
  0x25   :  { %129 = vperm.xlu0 %527, %v657_v17  }
  0x26   :  { %124 = vperm.xlu1 %528, %v659_v18  }
  0x27   :  { %490 = vmatmul.msk.f32.gmra.mxu0 %vm177_vm0, %v50_v19 }
  0x28   :  { %501 = vmatmul.msk.f32.gmra.mxu2 %vm177_vm0, %v61_v20  ;;  %119 = vperm.xlu2 %529, %v663_v21  }
  0x2d   :  { %114 = vperm.xlu0 %527, %v668_v22  }
  0x2e   :  { %109 = vperm.xlu1 %528, %v670_v23  }
  0x2f   :  { %491 = vmatmul.msk.f32.gmra.mxu0 %vm177_vm0, %v51_v24 }
  0x30   :  { %502 = vmatmul.msk.f32.gmra.mxu2 %vm177_vm0, %v62_v25  ;;  %104 = vperm.xlu2 %529, %v674_v26  }
  0x35   :  { %99 = vperm.xlu0 %527, %v679_v27  }
  0x36   :  { %530 = vset.pattern.permute.xlu1 %v593_v9 }
  0x37   :  { %492 = vmatmul.msk.f32.gmra.mxu0 %vm177_vm0, %v52_v28  ;;  %368 = vperm.xlu1 %530, %v621_v1  }
  0x38   :  { %531 = vset.pattern.permute.xlu2 %v593_v9 }
  0x39   :  { %364 = vperm.xlu2 %531, %v635_v7  }
  0x3d   :  { %532 = vset.pattern.permute.xlu0 %v593_v9 }
  0x3e   :  { %360 = vperm.xlu0 %532, %v623_v2  }
  0x3f   :  { %493 = vmatmul.msk.f32.gmra.mxu0 %vm177_vm0, %v53_v29  ;;  %356 = vperm.xlu1 %530, %v637_v8  }
  0x41   :  { %352 = vperm.xlu2 %531, %v632_v6  }
  0x46   :  { %340 = vperm.xlu0 %532, %v648_v13  }
  0x47   :  { %494 = vmatmul.msk.f32.gmra.mxu0 %vm177_vm0, %v54_v30  ;;  %348 = vperm.xlu1 %530, %v641_v11  }
  0x49   :  { %344 = vperm.xlu2 %531, %v646_v12  }
  0x4e   :  { %328 = vperm.xlu0 %532, %v659_v18  }
  0x4f   :  { %495 = vmatmul.msk.f32.gmra.mxu0 %vm177_vm0, %v55_v31  ;;  %336 = vperm.xlu1 %530, %v652_v16   ;;  %v72_v16 = vld [vmem:[#allocation4 + $0x48] sm:$0xff] }
  0x51   :  { %332 = vperm.xlu2 %531, %v657_v17   ;;  %v73_v17 = vld [vmem:[#allocation4 + $0x50] sm:$0xff] }
  0x56   :  { %316 = vperm.xlu0 %532, %v670_v23   ;;  %v64_v23 = vld [vmem:[#allocation4 + $0x8] sm:$0xff] }
  0x57   :  { %496 = vmatmul.msk.f32.gmra.mxu0 %vm177_vm0, %v56_v32  ;;  %324 = vperm.xlu1 %530, %v663_v21   ;;  %v67_v21 = vld [vmem:[#allocation4 + $0x20] sm:$0xff] }
  0x59   :  { %320 = vperm.xlu2 %531, %v668_v22   ;;  %v76_v22 = vld [vmem:[#allocation4 + $0x68] sm:$0xff] }
  0x5f   :  { %497 = vmatmul.msk.f32.gmra.mxu0 %vm177_vm0, %v57_v33  ;;  %312 = vperm.xlu1 %530, %v674_v26   ;;  %v69_v26 = vld [vmem:[#allocation4 + $0x30] sm:$0xff] }
  0x61   :  { %308 = vperm.xlu2 %531, %v679_v27  }
  0x6a   :  { %v155_v56 = vpop.permute.xlu2 %154 }
  0x72   :  { %v150_v62 = vpop.permute.xlu2 %149 }
  0x7a   :  { %v135_v5 = vpop.permute.xlu2 %134 }
  0x7f   :  { %v175_v41 = vpop.permute.xlu0 %174 }
  0x80   :  { %v165_v42 = vpop.permute.xlu1 %164 }
  0x82   :  { %v120_v28 = vpop.permute.xlu2 %119 }
  0x87   :  { %v170_v45 = vpop.permute.xlu0 %169 }
  0x88   :  { %v160_v50 = vpop.permute.xlu1 %159 }
  0x8c   :  { %v688_v34 = vpop.f32.mrf.mxu0 }
  0x8f   :  { %v145_v0 = vpop.permute.xlu0 %144 }
  0x90   :  { %v140_v3 = vpop.permute.xlu1 %139 }
  0x93   :  { %v276_v35 = vpop.f32.mrf.mxu2 }
  0x94   :  { %v690_v36 = vpop.f32.mrf.mxu0  ;;  %v277_v57 = vadd.f32 %v276_v35, %v155_v56 }
  0x96   :  { %v302_v60 = vmax.f32 %v277_v57, 0.0 }
  0x97   :  { %v130_v10 = vpop.permute.xlu0 %129 }
  0x98   :  { %v125_v20 = vpop.permute.xlu1 %124 }
  0x9b   :  { %v279_v37 = vpop.f32.mrf.mxu2 }
  0x9c   :  { %v692_v38 = vpop.f32.mrf.mxu0  ;;  %v280_v52 = vadd.f32 %v279_v37, %v160_v50  ;;  %v105_v37 = vpop.permute.xlu2 %104  ;;  %v78_v50 = vld [vmem:[#allocation4 + $0x78] sm:$0xff] }
  0x9e   :  { %v303_v58 = vmax.f32 %v280_v52, 0.0 }
  0x9f   :  { %v115_v1 = vpop.permute.xlu0 %114 }
  0xa0   :  { %v110_v13 = vpop.permute.xlu1 %109 }
  0xa3   :  { %v282_v39 = vpop.f32.mrf.mxu2 }
  0xa4   :  { %v694_v40 = vpop.f32.mrf.mxu0  ;;  %v283_v48 = vadd.f32 %v282_v39, %v165_v42  ;;  %v250_v39 = vadd.f32 %v692_v38, %v110_v13 }
  0xa5   :  { %v253_v6 = vadd.f32 %v694_v40, %v115_v1  ;;  %v63_v40 = vld [vmem:[#allocation4] sm:$0xff] }
  0xa6   :  { %v304_v55 = vmax.f32 %v283_v48, 0.0  ;;  %v293_v11 = vmax.f32 %v250_v39, 0.0  ;;  %v68_v48 = vld [vmem:[#allocation4 + $0x28] sm:$0xff] }
  0xa7   :  { %v100_v42 = vpop.permute.xlu0 %99 }
  0xa8   :  { %v244_v18 = vadd.f32 %v688_v34, %v100_v42  ;;  %v65_v34 = vld [vmem:[#allocation4 + $0x10] sm:$0xff] }
  0xaa   :  { %v291_v38 = vmax.f32 %v244_v18, 0.0 }
  0xab   :  { %v285_v43 = vpop.f32.mrf.mxu2 }
  0xac   :  { %v696_v44 = vpop.f32.mrf.mxu0  ;;  %v286_v46 = vadd.f32 %v285_v43, %v170_v45  ;;  %v247_v43 = vadd.f32 %v690_v36, %v105_v37  ;;  %v71_v36 = vld [vmem:[#allocation4 + $0x40] sm:$0xff]  ;;  %v74_v45 = vld [vmem:[#allocation4 + $0x58] sm:$0xff] }
  0xad   :  { %v256_v8 = vadd.f32 %v696_v44, %v120_v28  ;;  %v294_v44 = vmax.f32 %v253_v6, 0.0 }
  0xae   :  { %v305_v53 = vmax.f32 %v286_v46, 0.0  ;;  %v292_v12 = vmax.f32 %v247_v43, 0.0  ;;  %v66_v46 = vld [vmem:[#allocation4 + $0x18] sm:$0xff] }
  0xb3   :  { %v288_v47 = vpop.f32.mrf.mxu2 }
  0xb4   :  { %v289_v49 = vadd.f32 %v288_v47, %v175_v41  ;;  %v258_v51 = vpop.f32.mrf.mxu0  ;;  %v295_v41 = vmax.f32 %v256_v8, 0.0  ;;  %v75_v47 = vld [vmem:[#allocation4 + $0x60] sm:$0xff] }
  0xb5   :  { %v259_v31 = vadd.f32 %v258_v51, %v125_v20  ;;  %v70_v51 = vld [vmem:[#allocation4 + $0x38] sm:$0xff] }
  0xb6   :  { %v306_v54 = vmax.f32 %v289_v49, 0.0  ;;  %v77_v49 = vld [vmem:[#allocation4 + $0x70] sm:$0xff] }
  0xb7   :  { %v296_v35 = vmax.f32 %v259_v31, 0.0  ;;  %v594_v31 = vmov 2  }
  0xb8   :  { %371 = vmatpush.msra.mxu1 %v306_v54  ;;  %504 = vmatpush.msra.mxu3 %v306_v54 }
  0xb9   :  { %533 = vset.pattern.permute.xlu0 %v594_v31 }
  0xba   :  { %372 = vmatpush.msra.mxu1 %v305_v53  ;;  %505 = vmatpush.msra.mxu3 %v305_v53 }
  0xbb   :  { %454 = vperm.xlu0 %533, %v679_v27  }
  0xbc   :  { %373 = vmatpush.msra.mxu1 %v304_v55  ;;  %506 = vmatpush.msra.mxu3 %v304_v55  ;;  %v261_v59 = vpop.f32.mrf.mxu0 }
  0xbd   :  { %v262_v2 = vadd.f32 %v261_v59, %v130_v10  ;;  %v361_v10 = vpop.permute.xlu0 %360 }
  0xbe   :  { %374 = vmatpush.msra.mxu1 %v303_v58  ;;  %507 = vmatpush.msra.mxu3 %v303_v58 }
  0xbf   :  { %v297_v33 = vmax.f32 %v262_v2, 0.0 }
  0xc0   :  { %375 = vmatpush.msra.mxu1 %v302_v60  ;;  %508 = vmatpush.msra.mxu3 %v302_v60  ;;  %v369_v60 = vpop.permute.xlu1 %368 }
  0xc4   :  { %v264_v61 = vpop.f32.mrf.mxu0 }
  0xc5   :  { %v265_v29 = vadd.f32 %v264_v61, %v135_v5  ;;  %v365_v61 = vpop.permute.xlu2 %364 }
  0xc7   :  { %v298_v32 = vmax.f32 %v265_v29, 0.0 }
  0xcc   :  { %v267_v63 = vpop.f32.mrf.mxu0 }
  0xcd   :  { %v268_v24 = vadd.f32 %v267_v63, %v140_v3 }
  0xcf   :  { %v299_v7 = vmax.f32 %v268_v24, 0.0 }
  0xd4   :  { %v270_v4 = vpop.f32.mrf.mxu0 }
  0xd5   :  { %v271_v15 = vadd.f32 %v270_v4, %v145_v0  ;;  %v357_v0 = vpop.permute.xlu1 %356  ;;  %v353_v4 = vpop.permute.xlu2 %352 }
  0xd7   :  { %v300_v30 = vmax.f32 %v271_v15, 0.0 }
  0xdc   :  { %v273_v14 = vpop.f32.mrf.mxu0 }
  0xdd   :  { %v274_v19 = vadd.f32 %v273_v14, %v150_v62  ;;  %v349_v14 = vpop.permute.xlu1 %348  ;;  %v345_v15 = vpop.permute.xlu2 %344 }
  0xdf   :  { %v301_v25 = vmax.f32 %v274_v19, 0.0 }
  0xe1   :  { %376 = vmatpush.msra.mxu1 %v301_v25  ;;  %509 = vmatpush.msra.mxu3 %v301_v25 }
  0xe3   :  { %377 = vmatpush.msra.mxu1 %v300_v30  ;;  %510 = vmatpush.msra.mxu3 %v300_v30  ;;  %v341_v30 = vpop.permute.xlu0 %340 }
  0xe5   :  { %378 = vmatpush.msra.mxu1 %v299_v7  ;;  %511 = vmatpush.msra.mxu3 %v299_v7  ;;  %v337_v1 = vpop.permute.xlu1 %336 }
  0xe7   :  { %379 = vmatpush.msra.mxu1 %v298_v32  ;;  %512 = vmatpush.msra.mxu3 %v298_v32  ;;  %v333_v32 = vpop.permute.xlu2 %332 }
  0xe9   :  { %380 = vmatpush.msra.mxu1 %v297_v33  ;;  %513 = vmatpush.msra.mxu3 %v297_v33 }
  0xeb   :  { %381 = vmatpush.msra.mxu1 %v296_v35  ;;  %514 = vmatpush.msra.mxu3 %v296_v35  ;;  %v329_v39 = vpop.permute.xlu0 %328 }
  0xed   :  { %382 = vmatpush.msra.mxu1 %v295_v41  ;;  %515 = vmatpush.msra.mxu3 %v295_v41 }
  0xef   :  { %383 = vmatpush.msra.mxu1 %v294_v44  ;;  %516 = vmatpush.msra.mxu3 %v294_v44  ;;  %v325_v44 = vpop.permute.xlu1 %324 }
  0xf1   :  { %384 = vmatpush.msra.mxu1 %v293_v11  ;;  %517 = vmatpush.msra.mxu3 %v293_v11 }
  0xf3   :  { %385 = vmatpush.msra.mxu1 %v292_v12  ;;  %518 = vmatpush.msra.mxu3 %v292_v12  ;;  %v321_v12 = vpop.permute.xlu2 %320 }
  0xf5   :  { %386 = vmatpush.msra.mxu1 %v291_v38  ;;  %519 = vmatpush.msra.mxu3 %v291_v38 }
  0xf6   :  { %411 = vmatmul.f32.vlgmr.msra.gmra.mxu3 %v71_v36  ;;  %387 = vmatmul.f32.vlgmr.msra.gmra.mxu1 %v63_v40 }
  0xfe   :  { %414 = vmatmul.f32.gmra.mxu3 %v72_v16  ;;  %390 = vmatmul.f32.gmra.mxu1 %v64_v23 }
 0x106   :  { %417 = vmatmul.f32.gmra.mxu3 %v73_v17  ;;  %393 = vmatmul.f32.gmra.mxu1 %v65_v34  ;;  %v317_v17 = vpop.permute.xlu0 %316 }
 0x10e   :  { %420 = vmatmul.f32.gmra.mxu3 %v74_v45  ;;  %396 = vmatmul.f32.gmra.mxu1 %v66_v46  ;;  %v313_v46 = vpop.permute.xlu1 %312 }
 0x116   :  { %423 = vmatmul.f32.gmra.mxu3 %v75_v47  ;;  %399 = vmatmul.f32.gmra.mxu1 %v67_v21 }
 0x11e   :  { %426 = vmatmul.f32.gmra.mxu3 %v76_v22  ;;  %402 = vmatmul.f32.gmra.mxu1 %v68_v48  ;;  %v309_v22 = vpop.permute.xlu2 %308 }
 0x126   :  { %429 = vmatmul.f32.gmra.mxu3 %v77_v49  ;;  %405 = vmatmul.f32.gmra.mxu1 %v69_v26 }
 0x12e   :  { %432 = vmatmul.f32.gmra.mxu3 %v78_v50  ;;  %408 = vmatmul.f32.gmra.mxu1 %v70_v51 }
 0x173   :  { %v719_v52 = vpop.f32.mrf.mxu1 }
 0x174   :  { %v389_v26 = vadd.f32 %v719_v52, %v309_v22 }
 0x179   :  { %v412_v53 = vpop.f32.mrf.mxu3 }
 0x17a   :  { %v413_v42 = vadd.f32 %v412_v53, %v341_v30  ;;  %v436_v53 = vmax.f32 %v389_v26, 0.0 }
 0x17b   :  { %v721_v54 = vpop.f32.mrf.mxu1 }
 0x17c   :  { %v444_v27 = vmax.f32 %v413_v42, 0.0  ;;  %v392_v49 = vadd.f32 %v721_v54, %v313_v46 }
 0x17e   :  { %v437_v51 = vmax.f32 %v392_v49, 0.0 }
 0x181   :  { %v415_v55 = vpop.f32.mrf.mxu3 }
 0x182   :  { %v416_v35 = vadd.f32 %v415_v55, %v345_v15  ;;  %v79_v55 = vld [vmem:[#allocation4 + $0x80] sm:$0xff] }
 0x183   :  { %v723_v57 = vpop.f32.mrf.mxu1 }
 0x184   :  { %v445_v11 = vmax.f32 %v416_v35, 0.0  ;;  %v395_v21 = vadd.f32 %v723_v57, %v317_v17 }
 0x186   :  { %v438_v50 = vmax.f32 %v395_v21, 0.0 }
 0x189   :  { %v418_v56 = vpop.f32.mrf.mxu3 }
 0x18a   :  { %v419_v13 = vadd.f32 %v418_v56, %v349_v14  ;;  %v455_v56 = vpop.permute.xlu0 %454 }
 0x18b   :  { %v397_v59 = vpop.f32.mrf.mxu1 }
 0x18c   :  { %v446_v43 = vmax.f32 %v419_v13, 0.0  ;;  %v398_v34 = vadd.f32 %v397_v59, %v321_v12 }
 0x18e   :  { %v439_v48 = vmax.f32 %v398_v34, 0.0 }
 0x191   :  { %v421_v58 = vpop.f32.mrf.mxu3 }
 0x192   :  { %v422_v8 = vadd.f32 %v421_v58, %v353_v4 }
 0x193   :  { %v400_v63 = vpop.f32.mrf.mxu1 }
 0x194   :  { %v447_v37 = vmax.f32 %v422_v8, 0.0  ;;  %v401_v16 = vadd.f32 %v400_v63, %v325_v44 }
 0x196   :  { %v440_v47 = vmax.f32 %v401_v16, 0.0 }
 0x199   :  { %v424_v62 = vpop.f32.mrf.mxu3 }
 0x19a   :  { %v425_v2 = vadd.f32 %v424_v62, %v357_v0 }
 0x19b   :  { %v403_v5 = vpop.f32.mrf.mxu1 }
 0x19c   :  { %v448_v6 = vmax.f32 %v425_v2, 0.0  ;;  %v404_v36 = vadd.f32 %v403_v5, %v329_v39 }
 0x19e   :  { %v441_v45 = vmax.f32 %v404_v36, 0.0 }
 0x1a1   :  { %v427_v3 = vpop.f32.mrf.mxu3 }
 0x1a2   :  { %v428_v28 = vadd.f32 %v427_v3, %v361_v10 }
 0x1a3   :  { %v406_v25 = vpop.f32.mrf.mxu1 }
 0x1a4   :  { %v449_v33 = vmax.f32 %v428_v28, 0.0  ;;  %v407_v38 = vadd.f32 %v406_v25, %v333_v32 }
 0x1a6   :  { %v442_v23 = vmax.f32 %v407_v38, 0.0 }
 0x1a9   :  { %v430_v9 = vpop.f32.mrf.mxu3 }
 0x1aa   :  { %v431_v20 = vadd.f32 %v430_v9, %v365_v61 }
 0x1ab   :  { %v409_v41 = vpop.f32.mrf.mxu1 }
 0x1ac   :  { %v450_v7 = vmax.f32 %v431_v20, 0.0  ;;  %v410_v18 = vadd.f32 %v409_v41, %v337_v1 }
 0x1ae   :  { %v443_v40 = vmax.f32 %v410_v18, 0.0 }
 0x1b1   :  { %v433_v19 = vpop.f32.mrf.mxu3 }
 0x1b2   :  { %v434_v24 = vadd.f32 %v433_v19, %v369_v60 }
 0x1b4   :  { %v451_v29 = vmax.f32 %v434_v24, 0.0 }
 0x1b6   :  { %457 = vmatpush.msrb.mxu2 %v451_v29 }
 0x1b8   :  { %458 = vmatpush.msrb.mxu2 %v450_v7 }
 0x1ba   :  { %459 = vmatpush.msrb.mxu2 %v449_v33 }
 0x1bc   :  { %460 = vmatpush.msrb.mxu2 %v448_v6 }
 0x1be   :  { %461 = vmatpush.msrb.mxu2 %v447_v37 }
 0x1c0   :  { %462 = vmatpush.msrb.mxu2 %v446_v43 }
 0x1c2   :  { %463 = vmatpush.msrb.mxu2 %v445_v11 }
 0x1c4   :  { %464 = vmatpush.msrb.mxu2 %v444_v27 }
 0x1c6   :  { %465 = vmatpush.msrb.mxu2 %v443_v40 }
 0x1c8   :  { %466 = vmatpush.msrb.mxu2 %v442_v23 }
 0x1ca   :  { %467 = vmatpush.msrb.mxu2 %v441_v45 }
 0x1cc   :  { %468 = vmatpush.msrb.mxu2 %v440_v47 }
 0x1ce   :  { %469 = vmatpush.msrb.mxu2 %v439_v48 }
 0x1d0   :  { %470 = vmatpush.msrb.mxu2 %v438_v50 }
 0x1d2   :  { %471 = vmatpush.msrb.mxu2 %v437_v51 }
 0x1d4   :  { %472 = vmatpush.msrb.mxu2 %v436_v53 }
 0x1d5   :  { %473 = vmatmul.f32.vlgmr.msrb.gmra.mxu2 %v79_v55 }
 0x258   :  { %v474_v58 = vpop.f32.mrf.mxu2 }
 0x259   :  { %v475_v57 = vadd.f32 %v474_v58, %v455_v56 }
 0x25b   :  { %534 = vtanh.f32 %v475_v57 }
 0x261   :  { %v535_v59 = vpop.eup %534 }
 0x262   :  { %v478_v60 = vmul.f32 2.0, %v535_v59 }
 0x264   :  { %480 = vst.msk [vmem:[%s735_s3] sm:$0xff] %vm479_vm1, %v478_v60 }
 0x265   :  { %485 = vsyncpa [#allocation3], 1 }
 0x266   :  { %486 = vsyncpa [#allocation5], 1 }

</bundles_post_ra>
